<compile_context>
chip_gen: v6e
topology: v6e:2x2x1
jax: 0.10.0
libtpu: 0.0.40
codegen_flags: <defaults>
</compile_context>

<pallas_src>
import functools

import jax
import jax.numpy as jnp
from jax.experimental import pallas as pl
from jax.experimental.pallas import tpu as pltpu

HIDDEN = 128


def _round_up(x, m):
    return ((x + m - 1) // m) * m


def _critic_kernel(x_ref, w1_ref, b1_ref, w2_ref, b2_ref,
                   w3_ref, b3_ref, w4_ref, b4_ref, out_ref):
    # MXU compute dtype comes from the (already cast) weights; x_ref is already
    # in that dtype, so no input cast is needed in the kernel body.
    cdt = w1_ref.dtype

    h = jnp.dot(x_ref[...], w1_ref[...], preferred_element_type=jnp.float32) + b1_ref[...]
    h = jnp.maximum(h, 0.0)

    h = jnp.dot(h.astype(cdt), w2_ref[...], preferred_element_type=jnp.float32) + b2_ref[...]
    h = jnp.maximum(h, 0.0)

    h = jnp.dot(h.astype(cdt), w3_ref[...], preferred_element_type=jnp.float32) + b3_ref[...]
    h = jnp.maximum(h, 0.0)

    v = jnp.dot(h.astype(cdt), w4_ref[...], preferred_element_type=jnp.float32) + b4_ref[...]
    v = jnp.maximum(v, 0.0)  # fc4 is Sequential(Linear, ReLU) in the PyTorch module

    out_ref[...] = v.astype(out_ref.dtype)


def prepare_params(params, compute_dtype=jnp.bfloat16):
    """One-time padding + cast of the master (f32) params into kernel layout.

    params: dict of w1..w4 with shape (in, out) and b1..b4 with shape (1, out).
    Returns a dict of device arrays:
      * w1 zero-padded on the contraction dim up to a multiple of 8,
      * w4 / b4 zero-padded on the output dim up to a multiple of 128
        (lane-dense stores in the kernel),
      * weights in compute_dtype (bf16 by default), biases kept in f32.
    """
    state_dim = params["w1"].shape[0]
    action_dim = params["w4"].shape[1]
    s_pad = _round_up(max(state_dim, 8), 8)
    n_pad = _round_up(max(action_dim, 128), 128)
    cdt = compute_dtype

    prep = {
        "w1": jnp.zeros((s_pad, HIDDEN), cdt).at[:state_dim, :].set(
            params["w1"].astype(cdt)),
        "w2": params["w2"].astype(cdt),
        "w3": params["w3"].astype(cdt),
        "w4": jnp.zeros((HIDDEN, n_pad), cdt).at[:, :action_dim].set(
            params["w4"].astype(cdt)),
        "b1": params["b1"].astype(jnp.float32),
        "b2": params["b2"].astype(jnp.float32),
        "b3": params["b3"].astype(jnp.float32),
        "b4": jnp.zeros((1, n_pad), jnp.float32).at[:, :action_dim].set(
            params["b4"].astype(jnp.float32)),
    }
    return prep


@functools.partial(jax.jit, static_argnames=("action_dim",))
def critic_forward(state, prep, action_dim):
    """state: (B, state_dim) f32.  prep: output of prepare_params()."""
    B, state_dim = state.shape
    s_pad = prep["w1"].shape[0]
    n_pad = prep["w4"].shape[1]
    cdt = prep["w1"].dtype

    # Build the padded activation directly in the compute dtype (halves the
    # per-tile input DMA; no cast in the kernel body).
    if state_dim == s_pad:
        x = state.astype(cdt)
    else:
        x = jnp.zeros((B, s_pad), cdt).at[:, :state_dim].set(state.astype(cdt))

    # Batch tiling: no padding of B up to a multiple of tm.  Pick tm ~ half the
    # 8-rounded batch (capped at 1024 rows) so the grid has >=2 tiles whenever
    # the batch allows it (keeps both v7x TensorCores busy) while each step
    # still amortizes the ~0.35us grid-step overhead.  The ragged last tile is
    # masked by Pallas.
    b_pad8 = _round_up(B, 8)
    if B <= 8:
        tm = B  # block dim == full array dim is always legal
    else:
        tm = max(8, min(1024, _round_up((b_pad8 + 1) // 2, 8)))
    grid = (pl.cdiv(B, tm),)

    # Advisory cost estimate so XLA can overlap this tiny call with the
    # surrounding prep/slice ops.
    flops = 2 * B * (s_pad * HIDDEN + 2 * HIDDEN * HIDDEN + HIDDEN * n_pad)
    bytes_accessed = (
        x.size * x.dtype.itemsize
        + sum(v.size * v.dtype.itemsize for v in prep.values())
        + B * n_pad * jnp.dtype(cdt).itemsize)

    # Whole-array, VMEM-resident specs for weights/biases (DMA'd once).
    vmem_full = pl.BlockSpec(memory_space=pltpu.MemorySpace.VMEM)

    out_padded = pl.pallas_call(
        _critic_kernel,
        out_shape=jax.ShapeDtypeStruct((B, n_pad), cdt),  # bf16 store: 2x less writeback
        grid=grid,
        in_specs=[
            pl.BlockSpec((tm, s_pad), lambda i: (i, 0)),   # activation stream (pipelined)
            vmem_full, vmem_full,                          # w1, b1
            vmem_full, vmem_full,                          # w2, b2
            vmem_full, vmem_full,                          # w3, b3
            vmem_full, vmem_full,                          # w4, b4
        ],
        out_specs=pl.BlockSpec((tm, n_pad), lambda i: (i, 0)),
        compiler_params=pltpu.CompilerParams(
            dimension_semantics=("parallel",)),            # shard batch tiles across TCs (v7x)
        cost_estimate=pl.CostEstimate(
            flops=flops, transcendentals=0, bytes_accessed=bytes_accessed),
    )(x, prep["w1"], prep["b1"], prep["w2"], prep["b2"],
      prep["w3"], prep["b3"], prep["w4"], prep["b4"])

    return out_padded[:, :action_dim].astype(jnp.float32)


def init_params(key, state_dim, action_dim, hidden=HIDDEN):
    """Deterministic synthetic init (PyTorch-Linear-style uniform bounds), f32 master weights."""
    dims = [(state_dim, hidden), (hidden, hidden), (hidden, hidden), (hidden, action_dim)]
    params = {}
    for i, (fan_in, fan_out) in enumerate(dims, start=1):
        key, kw, kb = jax.random.split(key, 3)
        bound = 1.0 / jnp.sqrt(float(fan_in))
        params[f"w{i}"] = jax.random.uniform(
            kw, (fan_in, fan_out), jnp.float32, -bound, bound)
        params[f"b{i}"] = jax.random.uniform(
            kb, (1, fan_out), jnp.float32, -bound, bound)
    return params


def reference_forward(state, params, compute_dtype=jnp.bfloat16):
    """Pure-JAX reference applying the identical cast/accumulation scheme."""
    x = state
    for i in range(1, 5):
        w = params[f"w{i}"].astype(compute_dtype)
        b = params[f"b{i}"].astype(jnp.float32)
        x = jnp.dot(x.astype(compute_dtype), w,
                    preferred_element_type=jnp.float32) + b
        x = jnp.maximum(x, 0.0)
    # Match the kernel's bf16 output store + wrapper upcast.
    return x.astype(compute_dtype).astype(jnp.float32)


if __name__ == "__main__":
    key = jax.random.PRNGKey(0)
    state_dim, action_dim = 4, 2

    kp, kx1, kx2, kx3 = jax.random.split(key, 4)
    params = init_params(kp, state_dim, action_dim)
    prep = prepare_params(params)  # one-time pad + bf16 cast, outside the forward

    # Tiny batch (block == full batch dim).
    state_tiny = jax.random.normal(kx1, (2, state_dim), jnp.float32)
    v_tiny = critic_forward(state_tiny, prep, action_dim)
    jax.block_until_ready(v_tiny)
    assert v_tiny.shape == (2, action_dim)
    assert jnp.allclose(v_tiny, reference_forward(state_tiny, params),
                        atol=2e-2, rtol=2e-2), "mismatch (B=2)"

    # Small RL-style batch (single grid step).
    state_small = jax.random.normal(kx2, (8, state_dim), jnp.float32)
    v_small = critic_forward(state_small, prep, action_dim)
    jax.block_until_ready(v_small)
    assert v_small.shape == (8, action_dim)
    assert jnp.allclose(v_small, reference_forward(state_small, params),
                        atol=2e-2, rtol=2e-2), "mismatch (B=8)"

    # Larger, non-multiple batch: 2 parallel tiles (tm=152), ragged last tile
    # masked by Pallas — no wasted batch padding.
    state_big = jax.random.normal(kx3, (300, state_dim), jnp.float32)
    v_big = critic_forward(state_big, prep, action_dim)
    jax.block_until_ready(v_big)
    assert v_big.shape == (300, action_dim)
    assert jnp.allclose(v_big, reference_forward(state_big, params),
                        atol=2e-2, rtol=2e-2), "mismatch (B=300)"

    print("KERNEL_OK")
</pallas_src>

<mosaic_0001>
module attributes {stable_mosaic.version = 11 : i64} {
  func.func @_critic_kernel(%arg0: i32, %arg1: memref<2x8xbf16, #tpu.memory_space<vmem>>, %arg2: memref<8x128xbf16, #tpu.memory_space<vmem>>, %arg3: memref<1x128xf32, #tpu.memory_space<vmem>>, %arg4: memref<128x128xbf16, #tpu.memory_space<vmem>>, %arg5: memref<1x128xf32, #tpu.memory_space<vmem>>, %arg6: memref<128x128xbf16, #tpu.memory_space<vmem>>, %arg7: memref<1x128xf32, #tpu.memory_space<vmem>>, %arg8: memref<128x128xbf16, #tpu.memory_space<vmem>>, %arg9: memref<1x128xf32, #tpu.memory_space<vmem>>, %arg10: memref<2x128xbf16, #tpu.memory_space<vmem>>) attributes {dimension_semantics = [#tpu.dimension_semantics<parallel>], iteration_bounds = array<i64: 1>, scalar_prefetch = 0 : i64, scratch_operands = 0 : i64, tpu.core_type = #tpu.core_type<tc>, window_params = [{transform_indices = @transform_0, window_bounds = array<i64: 2, 8>}, {pipeline_mode = #tpu.pipeline_mode<synchronous>, transform_indices = @transform_1, window_bounds = array<i64: 8, 128>}, {pipeline_mode = #tpu.pipeline_mode<synchronous>, transform_indices = @transform_2, window_bounds = array<i64: 1, 128>}, {pipeline_mode = #tpu.pipeline_mode<synchronous>, transform_indices = @transform_3, window_bounds = array<i64: 128, 128>}, {pipeline_mode = #tpu.pipeline_mode<synchronous>, transform_indices = @transform_4, window_bounds = array<i64: 1, 128>}, {pipeline_mode = #tpu.pipeline_mode<synchronous>, transform_indices = @transform_5, window_bounds = array<i64: 128, 128>}, {pipeline_mode = #tpu.pipeline_mode<synchronous>, transform_indices = @transform_6, window_bounds = array<i64: 1, 128>}, {pipeline_mode = #tpu.pipeline_mode<synchronous>, transform_indices = @transform_7, window_bounds = array<i64: 128, 128>}, {pipeline_mode = #tpu.pipeline_mode<synchronous>, transform_indices = @transform_8, window_bounds = array<i64: 1, 128>}, {transform_indices = @transform_9, window_bounds = array<i64: 2, 128>}]} {
    %c0 = arith.constant 0 : index
    %c0_0 = arith.constant 0 : index
    %0 = vector.load %arg1[%c0, %c0_0] : memref<2x8xbf16, #tpu.memory_space<vmem>>, vector<2x8xbf16>
    %c0_1 = arith.constant 0 : index
    %c0_2 = arith.constant 0 : index
    %1 = vector.load %arg2[%c0_1, %c0_2] : memref<8x128xbf16, #tpu.memory_space<vmem>>, vector<8x128xbf16>
    %cst = arith.constant dense<0.000000e+00> : vector<2x128xf32>
    %2 = tpu.matmul %0, %1, %cst {dimension_numbers = #tpu.dot_dimension_numbers<[1], [0], [0], [1], [0, 0, 1, 1], [], []>} : vector<2x8xbf16>, vector<8x128xbf16>, vector<2x128xf32> -> vector<2x128xf32>
    %c0_3 = arith.constant 0 : index
    %c0_4 = arith.constant 0 : index
    %3 = vector.load %arg3[%c0_3, %c0_4] : memref<1x128xf32, #tpu.memory_space<vmem>>, vector<1x128xf32>
    %4 = vector.broadcast %3 : vector<1x128xf32> to vector<2x128xf32>
    %5 = arith.addf %2, %4 : vector<2x128xf32>
    %cst_5 = arith.constant 0.000000e+00 : f32
    %6 = vector.broadcast %cst_5 : f32 to vector<2x128xf32>
    %7 = arith.maximumf %5, %6 : vector<2x128xf32>
    %8 = arith.truncf %7 : vector<2x128xf32> to vector<2x128xbf16>
    %c0_6 = arith.constant 0 : index
    %c0_7 = arith.constant 0 : index
    %9 = vector.load %arg4[%c0_6, %c0_7] : memref<128x128xbf16, #tpu.memory_space<vmem>>, vector<128x128xbf16>
    %cst_8 = arith.constant dense<0.000000e+00> : vector<2x128xf32>
    %10 = tpu.matmul %8, %9, %cst_8 {dimension_numbers = #tpu.dot_dimension_numbers<[1], [0], [0], [1], [0, 0, 1, 1], [], []>} : vector<2x128xbf16>, vector<128x128xbf16>, vector<2x128xf32> -> vector<2x128xf32>
    %c0_9 = arith.constant 0 : index
    %c0_10 = arith.constant 0 : index
    %11 = vector.load %arg5[%c0_9, %c0_10] : memref<1x128xf32, #tpu.memory_space<vmem>>, vector<1x128xf32>
    %12 = vector.broadcast %11 : vector<1x128xf32> to vector<2x128xf32>
    %13 = arith.addf %10, %12 : vector<2x128xf32>
    %cst_11 = arith.constant 0.000000e+00 : f32
    %14 = vector.broadcast %cst_11 : f32 to vector<2x128xf32>
    %15 = arith.maximumf %13, %14 : vector<2x128xf32>
    %16 = arith.truncf %15 : vector<2x128xf32> to vector<2x128xbf16>
    %c0_12 = arith.constant 0 : index
    %c0_13 = arith.constant 0 : index
    %17 = vector.load %arg6[%c0_12, %c0_13] : memref<128x128xbf16, #tpu.memory_space<vmem>>, vector<128x128xbf16>
    %cst_14 = arith.constant dense<0.000000e+00> : vector<2x128xf32>
    %18 = tpu.matmul %16, %17, %cst_14 {dimension_numbers = #tpu.dot_dimension_numbers<[1], [0], [0], [1], [0, 0, 1, 1], [], []>} : vector<2x128xbf16>, vector<128x128xbf16>, vector<2x128xf32> -> vector<2x128xf32>
    %c0_15 = arith.constant 0 : index
    %c0_16 = arith.constant 0 : index
    %19 = vector.load %arg7[%c0_15, %c0_16] : memref<1x128xf32, #tpu.memory_space<vmem>>, vector<1x128xf32>
    %20 = vector.broadcast %19 : vector<1x128xf32> to vector<2x128xf32>
    %21 = arith.addf %18, %20 : vector<2x128xf32>
    %cst_17 = arith.constant 0.000000e+00 : f32
    %22 = vector.broadcast %cst_17 : f32 to vector<2x128xf32>
    %23 = arith.maximumf %21, %22 : vector<2x128xf32>
    %24 = arith.truncf %23 : vector<2x128xf32> to vector<2x128xbf16>
    %c0_18 = arith.constant 0 : index
    %c0_19 = arith.constant 0 : index
    %25 = vector.load %arg8[%c0_18, %c0_19] : memref<128x128xbf16, #tpu.memory_space<vmem>>, vector<128x128xbf16>
    %cst_20 = arith.constant dense<0.000000e+00> : vector<2x128xf32>
    %26 = tpu.matmul %24, %25, %cst_20 {dimension_numbers = #tpu.dot_dimension_numbers<[1], [0], [0], [1], [0, 0, 1, 1], [], []>} : vector<2x128xbf16>, vector<128x128xbf16>, vector<2x128xf32> -> vector<2x128xf32>
    %c0_21 = arith.constant 0 : index
    %c0_22 = arith.constant 0 : index
    %27 = vector.load %arg9[%c0_21, %c0_22] : memref<1x128xf32, #tpu.memory_space<vmem>>, vector<1x128xf32>
    %28 = vector.broadcast %27 : vector<1x128xf32> to vector<2x128xf32>
    %29 = arith.addf %26, %28 : vector<2x128xf32>
    %cst_23 = arith.constant 0.000000e+00 : f32
    %30 = vector.broadcast %cst_23 : f32 to vector<2x128xf32>
    %31 = arith.maximumf %29, %30 : vector<2x128xf32>
    %32 = arith.truncf %31 : vector<2x128xf32> to vector<2x128xbf16>
    %c0_24 = arith.constant 0 : index
    %c0_25 = arith.constant 0 : index
    %33 = vector.load %arg10[%c0_24, %c0_25] : memref<2x128xbf16, #tpu.memory_space<vmem>>, vector<2x128xbf16>
    tpu.vector_store %arg10[%c0_24, %c0_25], %32 {strides = array<i32>} : memref<2x128xbf16, #tpu.memory_space<vmem>>, vector<2x128xbf16>,
    return
  }
  func.func @transform_0(%arg0: i32) -> (i32, i32) {
    %c0_i32 = arith.constant 0 : i32
    %c0_i32_0 = arith.constant 0 : i32
    return %arg0, %c0_i32 : i32, i32
  }
  func.func @transform_1(%arg0: i32) -> (i32, i32) {
    %c0_i32 = arith.constant 0 : i32
    %c0_i32_0 = arith.constant 0 : i32
    %c0_i32_1 = arith.constant 0 : i32
    return %c0_i32, %c0_i32_0 : i32, i32
  }
  func.func @transform_2(%arg0: i32) -> (i32, i32) {
    %c0_i32 = arith.constant 0 : i32
    %c0_i32_0 = arith.constant 0 : i32
    %c0_i32_1 = arith.constant 0 : i32
    return %c0_i32, %c0_i32_0 : i32, i32
  }
  func.func @transform_3(%arg0: i32) -> (i32, i32) {
    %c0_i32 = arith.constant 0 : i32
    %c0_i32_0 = arith.constant 0 : i32
    %c0_i32_1 = arith.constant 0 : i32
    return %c0_i32, %c0_i32_0 : i32, i32
  }
  func.func @transform_4(%arg0: i32) -> (i32, i32) {
    %c0_i32 = arith.constant 0 : i32
    %c0_i32_0 = arith.constant 0 : i32
    %c0_i32_1 = arith.constant 0 : i32
    return %c0_i32, %c0_i32_0 : i32, i32
  }
  func.func @transform_5(%arg0: i32) -> (i32, i32) {
    %c0_i32 = arith.constant 0 : i32
    %c0_i32_0 = arith.constant 0 : i32
    %c0_i32_1 = arith.constant 0 : i32
    return %c0_i32, %c0_i32_0 : i32, i32
  }
  func.func @transform_6(%arg0: i32) -> (i32, i32) {
    %c0_i32 = arith.constant 0 : i32
    %c0_i32_0 = arith.constant 0 : i32
    %c0_i32_1 = arith.constant 0 : i32
    return %c0_i32, %c0_i32_0 : i32, i32
  }
  func.func @transform_7(%arg0: i32) -> (i32, i32) {
    %c0_i32 = arith.constant 0 : i32
    %c0_i32_0 = arith.constant 0 : i32
    %c0_i32_1 = arith.constant 0 : i32
    return %c0_i32, %c0_i32_0 : i32, i32
  }
  func.func @transform_8(%arg0: i32) -> (i32, i32) {
    %c0_i32 = arith.constant 0 : i32
    %c0_i32_0 = arith.constant 0 : i32
    %c0_i32_1 = arith.constant 0 : i32
    return %c0_i32, %c0_i32_0 : i32, i32
  }
  func.func @transform_9(%arg0: i32) -> (i32, i32) {
    %c0_i32 = arith.constant 0 : i32
    %c0_i32_0 = arith.constant 0 : i32
    return %arg0, %c0_i32 : i32, i32
  }
}

</mosaic_0001>

<bundles_post_ra>
// kernel: critic_forward.1
= control target key start
LH: loop header
LB: loop body
LE: loop exit
PB: predicated region body
PF: predicated region fallthrough
CT: control target
= control target key end

     0   :  { %14 = vsyncpa [#allocation3], 0  ;;  %s818_s0 = inlined_call_operand.vmem [shape: bf16[2,8], index: 0, kind: input, shape index: {}]   ;;  %s819_s1 = inlined_call_operand.vmem [shape: bf16[8,128], index: 1, kind: input, shape index: {}]   ;;  %s820_s2 = inlined_call_operand.vmem [shape: f32[1,128], index: 2, kind: input, shape index: {}]   ;;  %s821_s3 = inlined_call_operand.hbm [shape: bf16[128,128], index: 3, kind: input, shape index: {}]   ;;  %s822_s4 = inlined_call_operand.vmem [shape: f32[1,128], index: 4, kind: input, shape index: {}]   ;;  %s823_s5 = inlined_call_operand.hbm [shape: bf16[128,128], index: 5, kind: input, shape index: {}]   ;;  %s824_s6 = inlined_call_operand.vmem [shape: f32[1,128], index: 6, kind: input, shape index: {}]   ;;  %s825_s7 = inlined_call_operand.hbm [shape: bf16[128,128], index: 7, kind: input, shape index: {}]   ;;  %s826_s8 = inlined_call_operand.vmem [shape: f32[1,128], index: 8, kind: input, shape index: {}]   ;;  %s827_s9 = inlined_call_operand.vmem [shape: bf16[2,128], index: 9, kind: output, shape index: {}]  }
   0x1   :  { %15 = vsyncpa [#allocation5], 0  ;;  %s698_s30 = smov [#allocation4]   ;;  %s699_s11 = smov [#allocation2]  }
   0x2   :  { %s41_s10 = sshll.u32 %s698_s30, 4  ;;  %s27_s12 = sshll.u32 %s699_s11, 4  ;;  %s42_s10 = int_to_ptr.vmem [resolvable:$true] %s41_s10  ;;  %s28_s12 = int_to_ptr.vmem [resolvable:$true] %s27_s12 }
   0x3   :  { %s642_s13 = scalar_lea.vmem %s42_s10, 1024  ;;  %p647_p1 = scmp.lt.s32.totalorder %s42_s10, %s42_s10 }
   0x4   :  { %p643_p0 = scmp.ne.s32.totalorder %s42_s10, %s642_s13  ;;  %p648_p2 = scmp.lt.s32.totalorder %s642_s13, %s642_s13 }
   0x6   :  { %p649_p3 = por %p648_p2, %p647_p1 }
   0x8   :  { %p650_p4 = pnand %p649_p3, %p643_p0 }
   0xa   :  { %653 = shalt.err (!%p650_p4)
}
   0xb   :  { %s700_s14 = smov 64   ;;  %s701_s15 = smov 4  }
   0xc   :  { %47 = dma.hbm_to_vmem [thread:$0]  %s823_s5, 1024, %s42_s10, [#allocation5], %s700_s14, %s700_s14, %s701_s15  }
   0xd   :  { %s662_s18 = scalar_lea.vmem %s28_s12, 1024  ;;  %p667_p6 = scmp.lt.s32.totalorder %s28_s12, %s28_s12 }
   0xe   :  { %p663_p5 = scmp.ne.s32.totalorder %s28_s12, %s662_s18  ;;  %p668_p7 = scmp.lt.s32.totalorder %s662_s18, %s662_s18 }
  0x10   :  { %p669_p8 = por %p668_p7, %p667_p6 }
  0x12   :  { %p670_p9 = pnand %p669_p8, %p663_p5 }
  0x14   :  { %673 = shalt.err (!%p670_p9)
}
  0x15   :  { %33 = dma.hbm_to_vmem [thread:$0]  %s821_s3, 1024, %s28_s12, [#allocation3], %s700_s14, %s700_s14, %s701_s15  }
  0x16   :  { %s702_s21 = smov [#allocation6]  }
  0x17   :  { %s55_s22 = sshll.u32 %s702_s21, 4  ;;  %s56_s22 = int_to_ptr.vmem [resolvable:$true] %s55_s22 }
  0x18   :  { %s682_s23 = scalar_lea.vmem %s56_s22, 1024  ;;  %p687_p11 = scmp.lt.s32.totalorder %s56_s22, %s56_s22 }
  0x19   :  { %p683_p10 = scmp.ne.s32.totalorder %s56_s22, %s682_s23  ;;  %p688_p12 = scmp.lt.s32.totalorder %s682_s23, %s682_s23 }
  0x1b   :  { %p689_p13 = por %p688_p12, %p687_p11 }
  0x1d   :  { %p690_p0 = pnand %p689_p13, %p683_p10 }
  0x1f   :  { %693 = shalt.err (!%p690_p0)
}
  0x20   :  { %61 = dma.hbm_to_vmem [thread:$0]  %s825_s7, 1024, %s56_s22, [#allocation5], %s700_s14, %s700_s14, %s701_s15  }
  0x21   :  { %694 = dma.done.wait [#allocation3], 1024  }
  0x22   :  { %695 = vsyncadd [#allocation3], 4294966272 }
  0x23   :  { %696 = dma.done.wait [#allocation5], 2048  }
  0x24   :  { %697 = vsyncadd [#allocation5], 4294965248  ;;  %v703_v0 = vmov 0.0   ;;  %vm704_vm0 = vmmov 0   ;;  %vm87_vm1 = vcmask 1043456   ;;  %vm83_vm2 = vcmask 64512  }
  0x25   :  { %537 = vmatprep.subr.bf16.mxu0 %v703_v0  ;;  %539 = vmatprep.mubr.msk.bf16.mxu0 %vm704_vm0, %v703_v0  ;;  %v75_v1 = vld [vmem:[%s819_s1] sm:$0xf]  ;;  %v610_v3 = vld [vmem:[#allocation2 + $0x38] sm:$0xff]   ;;  %v611_v5 = vld [vmem:[#allocation2 + $0x30] sm:$0xff]  }
  0x26   :  { %543 = vmatprep.subr.bf16.mxu1 %v703_v0  ;;  %559 = vmatprep.mubr.msk.bf16.mxu1 %vm704_vm0, %v703_v0  ;;  %v89_v2 = vsel %vm87_vm1, %v75_v1, 0  ;;  %v74_v4 = vld [vmem:[%s818_s0] sm:$0x1]  ;;  %v612_v6 = vld [vmem:[#allocation2 + $0x28] sm:$0xff]   ;;  %v614_v8 = vld [vmem:[#allocation2 + $0x18] sm:$0xff]  }
  0x27   :  { %538 = vmatpush3.bf16.msra.mxu0 %v89_v2  ;;  %544 = vmatpush3.bf16.msra.mxu1 %v610_v3  ;;  %v613_v7 = vld [vmem:[#allocation2 + $0x20] sm:$0xff]   ;;  %v615_v9 = vld [vmem:[#allocation2 + $0x10] sm:$0xff]   ;;  %v616_v10 = vld [vmem:[#allocation2 + $0x8] sm:$0xff]  }
  0x28   :  { %563 = vmatprep.subr.bf16.mxu0 %v703_v0  ;;  %545 = vmatprep.subr.bf16.mxu1 %v703_v0  ;;  %v617_v11 = vld [vmem:[#allocation2] sm:$0xff]   ;;  %v618_v12 = vld [vmem:[#allocation4 + $0x38] sm:$0xff]   ;;  %v619_v13 = vld [vmem:[#allocation4 + $0x30] sm:$0xff]  }
  0x29   :  { %v620_v14 = vld [vmem:[#allocation4 + $0x28] sm:$0xff]   ;;  %v621_v15 = vld [vmem:[#allocation4 + $0x20] sm:$0xff]   ;;  %v622_v16 = vld [vmem:[#allocation4 + $0x18] sm:$0xff]  }
  0x2a   :  { %540 = vmatmul.mubr.msk.bf16.vlgmr.msra.gmra.mxu0 %vm83_vm2, %v74_v4  ;;  %v623_v17 = vld [vmem:[#allocation4 + $0x10] sm:$0xff]   ;;  %v479_v18 = vld [vmem:[%s820_s2] ss:$0 sm:$0xff]  ;;  %v624_v26 = vld [vmem:[#allocation4 + $0x8] sm:$0xff]  }
  0x2b   :  { %579 = vmatprep.mubr.msk.bf16.mxu0 %vm704_vm0, %v703_v0  ;;  %546 = vmatpush3.bf16.msra.mxu1 %v611_v5  ;;  %v625_v27 = vld [vmem:[#allocation4] sm:$0xff]   ;;  %v626_v28 = vld [vmem:[#allocation6 + $0x38] sm:$0xff]   ;;  %v627_v29 = vld [vmem:[#allocation6 + $0x30] sm:$0xff]  }
  0x2c   :  { %547 = vmatprep.subr.bf16.mxu1 %v703_v0  ;;  %564 = vmatpush3.bf16.msra.mxu0 %v618_v12  ;;  %v628_v30 = vld [vmem:[#allocation6 + $0x28] sm:$0xff]   ;;  %v629_v31 = vld [vmem:[#allocation6 + $0x20] sm:$0xff]   ;;  %v630_v32 = vld [vmem:[#allocation6 + $0x18] sm:$0xff]  }
  0x2d   :  { %565 = vmatprep.subr.bf16.mxu0 %v703_v0  ;;  %v631_v33 = vld [vmem:[#allocation6 + $0x10] sm:$0xff]   ;;  %v481_v34 = vld [vmem:[%s822_s4] ss:$0 sm:$0xff]  ;;  %v632_v42 = vld [vmem:[#allocation6 + $0x8] sm:$0xff]  }
  0x2e   :  { %v633_v43 = vld [vmem:[#allocation6] sm:$0xff]  }
  0x2f   :  { %548 = vmatpush3.bf16.msra.mxu1 %v612_v6  ;;  %v490_v44 = vld [vmem:[%s824_s6] ss:$0 sm:$0xff] }
  0x30   :  { %549 = vmatprep.subr.bf16.mxu1 %v703_v0  ;;  %566 = vmatpush3.bf16.msra.mxu0 %v619_v13  ;;  %v499_v52 = vld [vmem:[%s826_s8] ss:$0 sm:$0xff] }
  0x31   :  { %567 = vmatprep.subr.bf16.mxu0 %v703_v0 }
  0x33   :  { %550 = vmatpush3.bf16.msra.mxu1 %v613_v7 }
  0x34   :  { %551 = vmatprep.subr.bf16.mxu1 %v703_v0  ;;  %568 = vmatpush3.bf16.msra.mxu0 %v620_v14 }
  0x35   :  { %569 = vmatprep.subr.bf16.mxu0 %v703_v0 }
  0x37   :  { %552 = vmatpush3.bf16.msra.mxu1 %v614_v8 }
  0x38   :  { %553 = vmatprep.subr.bf16.mxu1 %v703_v0  ;;  %570 = vmatpush3.bf16.msra.mxu0 %v621_v15 }
  0x39   :  { %571 = vmatprep.subr.bf16.mxu0 %v703_v0 }
  0x3b   :  { %554 = vmatpush3.bf16.msra.mxu1 %v615_v9 }
  0x3c   :  { %555 = vmatprep.subr.bf16.mxu1 %v703_v0  ;;  %572 = vmatpush3.bf16.msra.mxu0 %v622_v16 }
  0x3d   :  { %573 = vmatprep.subr.bf16.mxu0 %v703_v0 }
  0x3f   :  { %556 = vmatpush3.bf16.msra.mxu1 %v616_v10 }
  0x40   :  { %557 = vmatprep.subr.bf16.mxu1 %v703_v0  ;;  %574 = vmatpush3.bf16.msra.mxu0 %v623_v17 }
  0x41   :  { %575 = vmatprep.subr.bf16.mxu0 %v703_v0 }
  0x43   :  { %558 = vmatpush3.bf16.msra.mxu1 %v617_v11 }
  0x44   :  { %583 = vmatprep.subr.bf16.mxu1 %v703_v0  ;;  %576 = vmatpush3.bf16.msra.mxu0 %v624_v26 }
  0x45   :  { %577 = vmatprep.subr.bf16.mxu0 %v703_v0 }
  0x48   :  { %578 = vmatpush3.bf16.msra.mxu0 %v625_v27 }
  0xea   :  { %v125_v19 = vpop.f32.mrf.mxu0 }
  0xeb   :  { %v126_v20 = vadd.f32 %v479_v18, %v125_v19 }
  0xec   :  { %v541_v21 = vpop.f32.mrf.mxu0 }
  0xed   :  { %v131_v22 = vmax.f32 %v126_v20, 0.0 }
  0xee   :  { %v128_v23 = vpop.f32.mrf.mxu0 }
  0xef   :  { %v132_v24 = vpack.c.bf16 %v131_v22, %v131_v22 }
  0xf0   :  { %v542_v25 = vpop.f32.mrf.mxu0 }
  0xf1   :  { %560 = vmatmul.mubr.bf16.vlgmr.msra.gmra.mxu1 %v132_v24 }
  0xf2   :  { %599 = vmatprep.mubr.msk.bf16.mxu1 %vm704_vm0, %v703_v0  ;;  %584 = vmatpush3.bf16.msra.mxu1 %v626_v28 }
  0xf3   :  { %585 = vmatprep.subr.bf16.mxu1 %v703_v0 }
  0xf6   :  { %586 = vmatpush3.bf16.msra.mxu1 %v627_v29 }
  0xf7   :  { %587 = vmatprep.subr.bf16.mxu1 %v703_v0 }
  0xfa   :  { %588 = vmatpush3.bf16.msra.mxu1 %v628_v30 }
  0xfb   :  { %589 = vmatprep.subr.bf16.mxu1 %v703_v0 }
  0xfe   :  { %590 = vmatpush3.bf16.msra.mxu1 %v629_v31 }
  0xff   :  { %591 = vmatprep.subr.bf16.mxu1 %v703_v0 }
 0x102   :  { %592 = vmatpush3.bf16.msra.mxu1 %v630_v32 }
 0x103   :  { %593 = vmatprep.subr.bf16.mxu1 %v703_v0 }
 0x106   :  { %594 = vmatpush3.bf16.msra.mxu1 %v631_v33 }
 0x107   :  { %595 = vmatprep.subr.bf16.mxu1 %v703_v0 }
 0x10a   :  { %596 = vmatpush3.bf16.msra.mxu1 %v632_v42 }
 0x10b   :  { %597 = vmatprep.subr.bf16.mxu1 %v703_v0 }
 0x10e   :  { %598 = vmatpush3.bf16.msra.mxu1 %v633_v43 }
 0x1b1   :  { %v238_v35 = vpop.f32.mrf.mxu1 }
 0x1b2   :  { %v239_v36 = vadd.f32 %v481_v34, %v238_v35 }
 0x1b3   :  { %v561_v37 = vpop.f32.mrf.mxu1 }
 0x1b4   :  { %v244_v38 = vmax.f32 %v239_v36, 0.0 }
 0x1b5   :  { %v241_v39 = vpop.f32.mrf.mxu1 }
 0x1b6   :  { %v245_v40 = vpack.c.bf16 %v244_v38, %v244_v38 }
 0x1b7   :  { %v562_v41 = vpop.f32.mrf.mxu1 }
 0x1b8   :  { %580 = vmatmul.mubr.bf16.vlgmr.msra.gmra.mxu0 %v245_v40 }
 0x278   :  { %v351_v45 = vpop.f32.mrf.mxu0 }
 0x279   :  { %v352_v46 = vadd.f32 %v490_v44, %v351_v45 }
 0x27a   :  { %v581_v47 = vpop.f32.mrf.mxu0 }
 0x27b   :  { %v357_v48 = vmax.f32 %v352_v46, 0.0 }
 0x27c   :  { %v354_v49 = vpop.f32.mrf.mxu0 }
 0x27d   :  { %v358_v50 = vpack.c.bf16 %v357_v48, %v357_v48 }
 0x27e   :  { %v582_v51 = vpop.f32.mrf.mxu0 }
 0x27f   :  { %600 = vmatmul.mubr.bf16.vlgmr.msra.gmra.mxu1 %v358_v50 }
 0x33f   :  { %v464_v53 = vpop.f32.mrf.mxu1 }
 0x340   :  { %v465_v54 = vadd.f32 %v499_v52, %v464_v53 }
 0x341   :  { %v601_v55 = vpop.f32.mrf.mxu1 }
 0x342   :  { %v470_v56 = vmax.f32 %v465_v54, 0.0 }
 0x343   :  { %v467_v57 = vpop.f32.mrf.mxu1 }
 0x344   :  { %v471_v58 = vpack.c.bf16 %v470_v56, %v470_v56 }
 0x345   :  { %v602_v59 = vpop.f32.mrf.mxu1 }
 0x346   :  { %472 = vst [vmem:[%s827_s9] sm:$0x1] %v471_v58 }
 0x347   :  { %477 = vsyncpa [#allocation3], 1 }
 0x348   :  { %478 = vsyncpa [#allocation5], 1 }

</bundles_post_ra>
